<compile_context>
chip_gen: v7x
topology: tpu7x:2x2x1
jax: 0.10.0
libtpu: 0.0.40
codegen_flags: <defaults>
</compile_context>

<pallas_src>
import functools

import jax
import jax.numpy as jnp
from jax.experimental import pallas as pl
from jax.experimental.pallas import tpu as pltpu

EPS = 1e-5


def _round_up(x, m):
    return ((x + m - 1) // m) * m


def _pick_tile(dim, max_tile, align):
    """Largest tile (multiple of `align`, <= max_tile) minimizing padding waste."""
    dim_aligned = _round_up(dim, align)
    if dim_aligned <= max_tile:
        return dim_aligned
    best, best_pad = align, None
    start = max_tile - (max_tile % align)
    for cand in range(start, align - 1, -align):
        pad = _round_up(dim, cand) - dim
        if best_pad is None or pad < best_pad:
            best, best_pad = cand, pad
        if pad == 0:
            break
    return best


# --------------------------------------------------------------------------
# Kernels
# --------------------------------------------------------------------------
def _linear_bias_relu_kernel(x_ref, w_ref, b_ref, o_ref):
    """Single-shot: whole (padded) K fits one tile -> dot + bias + ReLU."""
    y = jnp.dot(x_ref[...], w_ref[...], preferred_element_type=jnp.float32)
    y = y + b_ref[...]                         # bias already has BN folded in
    o_ref[...] = jnp.maximum(y, 0.0).astype(o_ref.dtype)


def _linear_bias_relu_acc_kernel(x_ref, w_ref, b_ref, o_ref):
    """K-tiled: accumulate directly into the resident f32 output block."""
    k = pl.program_id(2)

    @pl.when(k == 0)
    def _():
        o_ref[...] = jnp.broadcast_to(b_ref[...], o_ref.shape)

    o_ref[...] += jnp.dot(
        x_ref[...], w_ref[...], preferred_element_type=jnp.float32
    )

    @pl.when(k == pl.num_programs(2) - 1)
    def _():
        o_ref[...] = jnp.maximum(o_ref[...], 0.0)


# --------------------------------------------------------------------------
# One-time parameter preparation (BN fold + padding) - call OUTSIDE hot path.
# --------------------------------------------------------------------------
def prepare_apopfail_params(w, b, gamma, beta, running_mean, running_var, *,
                            max_tn=512, max_tk=1024,
                            param_dtype=jnp.float32):
    """Fold eval-mode BatchNorm into (W, b) and pad to tile-divisible shapes.

    w: [F_in, F_out] (PyTorch Linear.weight transposed); others: [1, F_out].
    Returns (w_padded, b_padded, meta) where meta holds the static tiling info.
    """
    F_in, F_out = w.shape

    scale = gamma * jax.lax.rsqrt(running_var + EPS)          # [1, F_out]
    w_folded = (w * scale).astype(param_dtype)                # [F_in, F_out]
    b_folded = ((b - running_mean) * scale + beta).astype(jnp.float32)

    TN = _pick_tile(F_out, max_tn, 128)
    TK = _pick_tile(F_in, max_tk, 128)
    Np = _round_up(F_out, TN)
    Kp = _round_up(F_in, TK)

    if (Kp, Np) != (F_in, F_out):
        w_p = jnp.zeros((Kp, Np), param_dtype).at[:F_in, :F_out].set(w_folded)
    else:
        w_p = w_folded
    if Np != F_out:
        b_p = jnp.zeros((1, Np), jnp.float32).at[:, :F_out].set(b_folded)
    else:
        b_p = b_folded

    meta = {"f_out": F_out, "tn": TN, "tk": TK}
    return w_p, b_p, meta


# --------------------------------------------------------------------------
# Forward (hot path): only the activation may need padding.
# --------------------------------------------------------------------------
@functools.partial(
    jax.jit, static_argnames=("f_out", "tn", "tk", "max_tm", "compute_dtype")
)
def apopfail_block_forward(x, w_p, b_p, *, f_out, tn, tk,
                           max_tm=512, compute_dtype=jnp.float32):
    """Fused Linear + BatchNorm1d(eval) + ReLU + Dropout(eval).

    x:   [B, F_in] float32
    w_p: [Kp, Np]  folded+padded weights from prepare_apopfail_params
    b_p: [1, Np]   folded+padded bias
    returns [B, f_out] float32
    """
    B, F_in = x.shape
    Kp, Np = w_p.shape
    TN, TK = tn, tk

    TM = _pick_tile(B, max_tm, 8)
    Bp = _round_up(B, TM)

    # Megacore: make sure the two "parallel" axes have >= 2 tiles when possible
    # so both TensorCores on v7x get work.
    if (Bp // TM) * (Np // TN) < 2:
        if TM % 16 == 0:
            TM //= 2
        elif TN % 256 == 0:
            TN //= 2

    grid_i, grid_j, n_k = Bp // TM, Np // TN, Kp // TK

    x_c = x.astype(compute_dtype)
    if (Bp, Kp) != (B, F_in):
        x_p = jnp.zeros((Bp, Kp), compute_dtype).at[:B, :F_in].set(x_c)
    else:
        x_p = x_c
    w_c = w_p.astype(compute_dtype)      # no-op if prepared in compute_dtype

    itemsize = jnp.dtype(compute_dtype).itemsize
    cost = pl.CostEstimate(
        flops=2 * Bp * Np * Kp,
        transcendentals=0,
        bytes_accessed=(Bp * Kp + Kp * Np) * itemsize + Bp * Np * 4,
    )
    vmem_est = 2 * (TM * TK + TK * TN + TN) * itemsize + 2 * TM * TN * 4
    vmem_limit = int(min(max(vmem_est * 3 // 2, 16 * 2**20), 48 * 2**20))

    if n_k == 1:
        out_p = pl.pallas_call(
            _linear_bias_relu_kernel,
            out_shape=jax.ShapeDtypeStruct((Bp, Np), jnp.float32),
            grid_spec=pltpu.PrefetchScalarGridSpec(
                num_scalar_prefetch=0,
                grid=(grid_i, grid_j),
                in_specs=[
                    pl.BlockSpec((TM, TK), lambda i, j: (i, 0)),   # x tile
                    pl.BlockSpec((TK, TN), lambda i, j: (0, j)),   # folded W
                    pl.BlockSpec((1, TN), lambda i, j: (0, j)),    # folded bias
                ],
                out_specs=pl.BlockSpec((TM, TN), lambda i, j: (i, j)),
            ),
            compiler_params=pltpu.CompilerParams(
                dimension_semantics=("parallel", "parallel"),
                vmem_limit_bytes=vmem_limit,
            ),
            cost_estimate=cost,
        )(x_p, w_c, b_p)
    else:
        out_p = pl.pallas_call(
            _linear_bias_relu_acc_kernel,
            out_shape=jax.ShapeDtypeStruct((Bp, Np), jnp.float32),
            grid_spec=pltpu.PrefetchScalarGridSpec(
                num_scalar_prefetch=0,
                grid=(grid_i, grid_j, n_k),
                in_specs=[
                    pl.BlockSpec((TM, TK), lambda i, j, k: (i, k)),  # x tile
                    pl.BlockSpec((TK, TN), lambda i, j, k: (k, j)),  # folded W
                    pl.BlockSpec((1, TN), lambda i, j, k: (0, j)),   # folded bias
                ],
                out_specs=pl.BlockSpec((TM, TN), lambda i, j, k: (i, j)),
            ),
            compiler_params=pltpu.CompilerParams(
                dimension_semantics=("parallel", "parallel", "arbitrary"),
                vmem_limit_bytes=vmem_limit,
            ),
            cost_estimate=cost,
        )(x_p, w_c, b_p)

    if (Bp, Np) != (B, f_out):
        return out_p[:B, :f_out]
    return out_p


def _reference(x, w, b, gamma, beta, mean, var):
    y = x @ w + b
    y = (y - mean) / jnp.sqrt(var + EPS) * gamma + beta
    return jnp.maximum(y, 0.0)


if __name__ == "__main__":
    # Small shapes implied by the module: batch=8, in_features=32, out_features=64.
    B, F_IN, F_OUT = 8, 32, 64
    key = jax.random.PRNGKey(0)
    kx, kw, kb = jax.random.split(key, 3)

    x = jax.random.normal(kx, (B, F_IN), dtype=jnp.float32)

    # Deterministic parameter init (shapes match nn.Linear / nn.BatchNorm1d).
    bound = 1.0 / jnp.sqrt(F_IN)
    w = jax.random.uniform(kw, (F_IN, F_OUT), minval=-bound, maxval=bound,
                           dtype=jnp.float32)          # Linear.weight.T
    b = jax.random.uniform(kb, (1, F_OUT), minval=-bound, maxval=bound,
                           dtype=jnp.float32)          # Linear.bias
    gamma = jnp.ones((1, F_OUT), dtype=jnp.float32)    # BatchNorm1d.weight
    beta = jnp.zeros((1, F_OUT), dtype=jnp.float32)    # BatchNorm1d.bias
    running_mean = jnp.zeros((1, F_OUT), dtype=jnp.float32)
    running_var = jnp.ones((1, F_OUT), dtype=jnp.float32)

    # BN fold + weight padding happens ONCE, outside the hot path.
    w_p, b_p, meta = prepare_apopfail_params(
        w, b, gamma, beta, running_mean, running_var)
    w_p, b_p = jax.block_until_ready((w_p, b_p))

    out = apopfail_block_forward(
        x, w_p, b_p, f_out=meta["f_out"], tn=meta["tn"], tk=meta["tk"])
    out = jax.block_until_ready(out)

    ref = _reference(x, w, b, gamma, beta, running_mean, running_var)
    assert out.shape == (B, F_OUT)
    assert jnp.allclose(out, ref, atol=1e-5, rtol=1e-5)

    print("KERNEL_OK")
</pallas_src>

<mosaic_0001>
module attributes {stable_mosaic.version = 11 : i64} {
  func.func @_linear_bias_relu_kernel(%arg0: i32, %arg1: i32, %arg2: memref<8x128xf32, #tpu.memory_space<vmem>>, %arg3: memref<128x128xf32, #tpu.memory_space<vmem>>, %arg4: memref<1x128xf32, #tpu.memory_space<vmem>>, %arg5: memref<8x128xf32, #tpu.memory_space<vmem>>) attributes {dimension_semantics = [#tpu.dimension_semantics<parallel>, #tpu.dimension_semantics<parallel>], iteration_bounds = array<i64: 1, 1>, scalar_prefetch = 0 : i64, scratch_operands = 0 : i64, tpu.core_type = #tpu.core_type<tc>, window_params = [{transform_indices = @transform_0, window_bounds = array<i64: 8, 128>}, {transform_indices = @transform_1, window_bounds = array<i64: 128, 128>}, {transform_indices = @transform_2, window_bounds = array<i64: 1, 128>}, {transform_indices = @transform_3, window_bounds = array<i64: 8, 128>}]} {
    %c0 = arith.constant 0 : index
    %c0_0 = arith.constant 0 : index
    %0 = vector.load %arg2[%c0, %c0_0] : memref<8x128xf32, #tpu.memory_space<vmem>>, vector<8x128xf32>
    %c0_1 = arith.constant 0 : index
    %c0_2 = arith.constant 0 : index
    %1 = vector.load %arg3[%c0_1, %c0_2] : memref<128x128xf32, #tpu.memory_space<vmem>>, vector<128x128xf32>
    %cst = arith.constant dense<0.000000e+00> : vector<8x128xf32>
    %2 = tpu.matmul %0, %1, %cst {dimension_numbers = #tpu.dot_dimension_numbers<[1], [0], [0], [1], [0, 0, 1, 1], [], []>} : vector<8x128xf32>, vector<128x128xf32>, vector<8x128xf32> -> vector<8x128xf32>
    %c0_3 = arith.constant 0 : index
    %c0_4 = arith.constant 0 : index
    %3 = vector.load %arg4[%c0_3, %c0_4] : memref<1x128xf32, #tpu.memory_space<vmem>>, vector<1x128xf32>
    %4 = vector.broadcast %3 : vector<1x128xf32> to vector<8x128xf32>
    %5 = arith.addf %2, %4 : vector<8x128xf32>
    %cst_5 = arith.constant 0.000000e+00 : f32
    %6 = vector.broadcast %cst_5 : f32 to vector<8x128xf32>
    %7 = arith.maximumf %5, %6 : vector<8x128xf32>
    %c0_6 = arith.constant 0 : index
    %c0_7 = arith.constant 0 : index
    %8 = vector.load %arg5[%c0_6, %c0_7] : memref<8x128xf32, #tpu.memory_space<vmem>>, vector<8x128xf32>
    tpu.vector_store %arg5[%c0_6, %c0_7], %7 {strides = array<i32>} : memref<8x128xf32, #tpu.memory_space<vmem>>, vector<8x128xf32>,
    return
  }
  func.func @transform_0(%arg0: i32, %arg1: i32) -> (i32, i32) {
    %c0_i32 = arith.constant 0 : i32
    %c0_i32_0 = arith.constant 0 : i32
    return %arg0, %c0_i32 : i32, i32
  }
  func.func @transform_1(%arg0: i32, %arg1: i32) -> (i32, i32) {
    %c0_i32 = arith.constant 0 : i32
    %c0_i32_0 = arith.constant 0 : i32
    return %c0_i32, %arg1 : i32, i32
  }
  func.func @transform_2(%arg0: i32, %arg1: i32) -> (i32, i32) {
    %c0_i32 = arith.constant 0 : i32
    %c0_i32_0 = arith.constant 0 : i32
    return %c0_i32, %arg1 : i32, i32
  }
  func.func @transform_3(%arg0: i32, %arg1: i32) -> (i32, i32) {
    %c0_i32 = arith.constant 0 : i32
    return %arg0, %arg1 : i32, i32
  }
}

</mosaic_0001>

<bundles_post_ra>
// kernel: apopfail_block_forward.1
= control target key start
LH: loop header
LB: loop body
LE: loop exit
PB: predicated region body
PF: predicated region fallthrough
CT: control target
= control target key end

     0   :  { %8 = vsyncpa [#allocation3], 0  ;;  %s329_s0 = inlined_call_operand.vmem [shape: f32[8,128], index: 0, kind: input, shape index: {}]   ;;  %s330_s1 = inlined_call_operand.hbm [shape: f32[128,128], index: 1, kind: input, shape index: {}]   ;;  %s331_s2 = inlined_call_operand.vmem [shape: f32[1,128], index: 2, kind: input, shape index: {}]   ;;  %s332_s3 = inlined_call_operand.hbm [shape: f32[8,128], index: 3, kind: output, shape index: {}]  }
   0x1   :  { %9 = vsyncpa [#allocation4], 0  ;;  %s272_s12 = smov [#allocation2]   ;;  %s224_s16 = scalar_lea.hbm %s330_s1, 2048 }
   0x2   :  { %s17_s13 = sshll.u32 %s272_s12, 4  ;;  %p225_p0 = scmp.ne.s32.totalorder %s330_s1, %s224_s16  ;;  %s18_s13 = int_to_ptr.vmem [resolvable:$true] %s17_s13 }
   0x3   :  { %p228_p1 = scmp.lt.u32.totalorder %s224_s16, %s330_s1 }
   0x5   :  { %p230_p2 = pnand %p228_p1, %p225_p0 }
   0x7   :  { %233 = shalt.err (!%p230_p2)
}
   0x8   :  { %s234_s21 = scalar_lea.vmem %s18_s13, 2048  ;;  %p239_p4 = scmp.lt.s32.totalorder %s18_s13, %s18_s13 }
   0x9   :  { %p235_p3 = scmp.ne.s32.totalorder %s18_s13, %s234_s21  ;;  %p240_p5 = scmp.lt.s32.totalorder %s234_s21, %s234_s21 }
   0xb   :  { %p241_p6 = por %p240_p5, %p239_p4 }
   0xd   :  { %p242_p7 = pnand %p241_p6, %p235_p3 }
   0xf   :  { %245 = shalt.err (!%p242_p7)
}
  0x10   :  { %s273_s22 = smov 128   ;;  %s274_s23 = smov 8  }
  0x11   :  { %23 = dma.hbm_to_vmem [thread:$0]  %s330_s1, 2048, %s18_s13, [#allocation3], %s273_s22, %s273_s22, %s274_s23  }
  0x12   :  { %268 = dma.done.wait [#allocation3], 2048  }
  0x13   :  { %269 = vsyncadd [#allocation3], 4294965248  ;;  %v275_v0 = vmov 0.0|0.0   ;;  %vm276_vm0 = vmmov 0   ;;  %v277_v1 = vmov 0.0   ;;  %v30_v2 = vld [vmem:[#allocation2] sm:$0xff] }
  0x14   :  { %193 = vmatprep.subr.bf16.mxu0 %v275_v0  ;;  %190 = vmatprep.mubr.msk.f32.mxu0 %vm276_vm0, %v277_v1  ;;  %v31_v3 = vld [vmem:[#allocation2 + $0x8] sm:$0xff]  ;;  %v32_v4 = vld [vmem:[#allocation2 + $0x10] sm:$0xff]  ;;  %v33_v6 = vld [vmem:[#allocation2 + $0x18] sm:$0xff]  ;;  %s278_s29 = smov [#allocation5]  }
  0x15   :  { %v194_v5 = vpack.c.bf16 %v31_v3, %v30_v2  ;;  %v197_v7 = vpack.c.bf16 %v33_v6, %v32_v4  ;;  %v34_v8 = vld [vmem:[#allocation2 + $0x20] sm:$0xff]  ;;  %v35_v9 = vld [vmem:[#allocation2 + $0x28] sm:$0xff]  ;;  %v36_v11 = vld [vmem:[#allocation2 + $0x30] sm:$0xff]  ;;  %s131_s30 = sshll.u32 %s278_s29, 4  ;;  %s132_s30 = int_to_ptr.vmem [resolvable:$true] %s131_s30 }
  0x16   :  { %v200_v10 = vpack.c.bf16 %v35_v9, %v34_v8  ;;  %v37_v12 = vld [vmem:[#allocation2 + $0x38] sm:$0xff]  ;;  %v38_v14 = vld [vmem:[#allocation2 + $0x40] sm:$0xff]  ;;  %v39_v15 = vld [vmem:[#allocation2 + $0x48] sm:$0xff]  ;;  %s246_s4 = scalar_lea.vmem %s132_s30, 128  ;;  %p251_p9 = scmp.lt.s32.totalorder %s132_s30, %s132_s30 }
  0x17   :  { %195 = vmatpush3.bf16.msra.mxu0 %v194_v5  ;;  %v203_v13 = vpack.c.bf16 %v37_v12, %v36_v11  ;;  %v206_v16 = vpack.c.bf16 %v39_v15, %v38_v14  ;;  %v40_v17 = vld [vmem:[#allocation2 + $0x50] sm:$0xff]  ;;  %v41_v18 = vld [vmem:[#allocation2 + $0x58] sm:$0xff]  ;;  %v42_v20 = vld [vmem:[#allocation2 + $0x60] sm:$0xff]  ;;  %p247_p8 = scmp.ne.s32.totalorder %s132_s30, %s246_s4  ;;  %p252_p10 = scmp.lt.s32.totalorder %s246_s4, %s246_s4 }
  0x18   :  { %196 = vmatprep.subr.bf16.mxu0 %v275_v0  ;;  %v209_v19 = vpack.c.bf16 %v41_v18, %v40_v17  ;;  %v43_v21 = vld [vmem:[#allocation2 + $0x68] sm:$0xff]  ;;  %v44_v23 = vld [vmem:[#allocation2 + $0x70] sm:$0xff]  ;;  %v45_v24 = vld [vmem:[#allocation2 + $0x78] sm:$0xff] }
  0x19   :  { %v212_v22 = vpack.c.bf16 %v43_v21, %v42_v20  ;;  %v215_v25 = vpack.c.bf16 %v45_v24, %v44_v23  ;;  %v29_v26 = vld [vmem:[%s329_s0] sm:$0xff]  ;;  %p253_p11 = por %p252_p10, %p251_p9 }
  0x1a   :  { %v140_v27 = vld [vmem:[%s331_s2] ss:$0 sm:$0xff] }
  0x1b   :  { %198 = vmatpush3.bf16.msra.mxu0 %v197_v7  ;;  %p254_p12 = pnand %p253_p11, %p247_p8 }
  0x1c   :  { %199 = vmatprep.subr.bf16.mxu0 %v275_v0 }
  0x1f   :  { %201 = vmatpush3.bf16.msra.mxu0 %v200_v10 }
  0x20   :  { %202 = vmatprep.subr.bf16.mxu0 %v275_v0 }
  0x23   :  { %204 = vmatpush3.bf16.msra.mxu0 %v203_v13 }
  0x24   :  { %205 = vmatprep.subr.bf16.mxu0 %v275_v0 }
  0x27   :  { %207 = vmatpush3.bf16.msra.mxu0 %v206_v16 }
  0x28   :  { %208 = vmatprep.subr.bf16.mxu0 %v275_v0 }
  0x2b   :  { %210 = vmatpush3.bf16.msra.mxu0 %v209_v19 }
  0x2c   :  { %211 = vmatprep.subr.bf16.mxu0 %v275_v0 }
  0x2f   :  { %213 = vmatpush3.bf16.msra.mxu0 %v212_v22 }
  0x30   :  { %214 = vmatprep.subr.bf16.mxu0 %v275_v0 }
  0x33   :  { %216 = vmatpush3.bf16.msra.mxu0 %v215_v25 }
  0x36   :  { %191 = vmatmul.mubr.f32.vlgmr.msra.gmra.mrb[0].mxu0 %v29_v26 }
 0x109   :  { %v119_v28 = vpop.f32.mrb[0].mxu0 }
 0x10a   :  { %v120_v29 = vadd.f32 %v140_v27, %v119_v28  ;;  %v192_v30 = vpop.f32.mrb[1].mxu0 }
 0x10c   :  { %v123_v31 = vmax.f32 %v120_v29, 0.0 }
 0x10e   :  { %124 = vst [vmem:[#allocation5] sm:$0xff] %v123_v31 }
 0x10f   :  { %257 = shalt.err (!%p254_p12)
}
 0x110   :  { %s258_s6 = scalar_lea.hbm %s332_s3, 128 }
 0x111   :  { %p259_p13 = scmp.ne.s32.totalorder %s332_s3, %s258_s6  ;;  %p262_p0 = scmp.lt.u32.totalorder %s258_s6, %s332_s3 }
 0x113   :  { %p264_p1 = pnand %p262_p0, %p259_p13 }
 0x115   :  { %267 = shalt.err (!%p264_p1)
}
 0x116   :  { %134 = dma.vmem_to_hbm [thread:$0]  %s132_s30, 128, %s332_s3, [#allocation4]  }
 0x117   :  { %270 = dma.done.wait [#allocation4], 128  }
 0x118   :  { %271 = vsyncadd [#allocation4], 4294967168 }
 0x119   :  { %138 = vsyncpa [#allocation3], 1 }
 0x11a   :  { %139 = vsyncpa [#allocation4], 1 }

</bundles_post_ra>
